<compile_context>
chip_gen: v7x
topology: tpu7x:2x2x1
jax: 0.10.0
libtpu: 0.0.40
codegen_flags: <defaults>
</compile_context>

<pallas_src>
import math

import jax
import jax.numpy as jnp
from jax.experimental import pallas as pl
from jax.experimental.pallas import tpu as pltpu


# ----------------------------------------------------------------------------
# Stage 1: GroupNorm + fused QKV projection (one grid step per batch element).
# ----------------------------------------------------------------------------
def groupnorm_qkv_kernel(x_ref, gmat_ref, gamma_ref, beta_ref,
                         wqkv_ref, bqkv_ref, q_ref, k_ref, v_ref):
    x = x_ref[0]                               # (HW, C) f32
    HW, C = x.shape
    gmat = gmat_ref[...]                       # (C, G) one-hot channel->group
    G = gmat.shape[1]
    n_per_group = HW * (C // G)

    # ---- two-pass GroupNorm stats (f32): mean, then centered variance ----
    sum_c = jnp.sum(x, axis=0, keepdims=True)                              # (1, C)
    mean_g = jnp.dot(sum_c, gmat,
                     preferred_element_type=jnp.float32) / n_per_group     # (1, G)
    mean_c = jax.lax.dot_general(mean_g, gmat, (((1,), (1,)), ((), ())),
                                 preferred_element_type=jnp.float32)       # (1, C)
    xc = x - mean_c
    sqsum_c = jnp.sum(xc * xc, axis=0, keepdims=True)                      # (1, C)
    var_g = jnp.dot(sqsum_c, gmat,
                    preferred_element_type=jnp.float32) / n_per_group      # (1, G)
    var_c = jax.lax.dot_general(var_g, gmat, (((1,), (1,)), ((), ())),
                                preferred_element_type=jnp.float32)        # (1, C)
    inv_std_c = jax.lax.rsqrt(var_c + 1e-5)
    h = xc * inv_std_c * gamma_ref[...] + beta_ref[...]                    # (HW, C) f32

    # ---- fused 1x1-conv QKV projection: single (C, 3C) bf16 matmul ----
    qkv = jnp.dot(h.astype(jnp.bfloat16), wqkv_ref[...],
                  preferred_element_type=jnp.float32) + bqkv_ref[...]      # (HW, 3C) f32

    scale = jnp.float32(float(C) ** (-0.5))
    q_ref[0] = (qkv[:, :C] * scale).astype(jnp.bfloat16)   # scale folded into q
    k_ref[0] = qkv[:, C:2 * C].astype(jnp.bfloat16)
    v_ref[0] = qkv[:, 2 * C:].astype(jnp.bfloat16)


# ----------------------------------------------------------------------------
# Stage 2: flash attention + output projection + residual.
# grid = (B, num_q_tiles, num_kv_tiles); KV axis is the (arbitrary) reduction.
# ----------------------------------------------------------------------------
def flash_attn_kernel(x_ref, q_ref, k_ref, v_ref, wp_ref, bp_ref, out_ref,
                      m_sc, l_sc, acc_sc):
    ki = pl.program_id(2)

    @pl.when(ki == 0)
    def _():
        m_sc[...] = jnp.full_like(m_sc, -jnp.inf)
        l_sc[...] = jnp.zeros_like(l_sc)
        acc_sc[...] = jnp.zeros_like(acc_sc)

    q = q_ref[0]                               # (TQ, C) bf16, pre-scaled by C^-0.5
    k = k_ref[0]                               # (TK, C) bf16
    v = v_ref[0]                               # (TK, C) bf16

    # contract the channel axis of both operands directly (no k.T materialized)
    s = jax.lax.dot_general(q, k, (((1,), (1,)), ((), ())),
                            preferred_element_type=jnp.float32)            # (TQ, TK)

    m_prev = m_sc[...]
    m_new = jnp.maximum(m_prev, jnp.max(s, axis=-1, keepdims=True))
    alpha = jnp.exp(m_prev - m_new)            # rescale factor for running stats
    p = jnp.exp(s - m_new)                     # unnormalized probabilities, f32
    l_sc[...] = alpha * l_sc[...] + jnp.sum(p, axis=-1, keepdims=True)
    acc_sc[...] = alpha * acc_sc[...] + jnp.dot(
        p.astype(jnp.bfloat16), v, preferred_element_type=jnp.float32)
    m_sc[...] = m_new

    @pl.when(ki == pl.num_programs(2) - 1)
    def _():
        # deferred softmax normalization: one EUP reciprocal + (TQ, C) multiply
        attn = acc_sc[...] * pl.reciprocal(l_sc[...], approx=True)         # (TQ, C)
        proj = jnp.dot(attn.astype(jnp.bfloat16), wp_ref[...],
                       preferred_element_type=jnp.float32) + bp_ref[...]
        out_ref[0] = x_ref[0] + proj


# ----------------------------------------------------------------------------
# Wrapper: layout conversion + two pallas_calls.
# ----------------------------------------------------------------------------
def _pick_tile(hw, target):
    t = min(target, hw)
    while hw % t != 0:
        t //= 2
    return max(t, 1)


def attn_block(x_nchw, params, *, tq=256, tk=512):
    B, C, H, W = x_nchw.shape
    HW = H * W
    G = params["gmat"].shape[1]
    tq = _pick_tile(HW, tq)
    tk = _pick_tile(HW, tk)
    nq, nk = HW // tq, HW // tk
    # TODO(synk): ragged HW (not divisible by the tile) would need masking.

    # NCHW -> (B, HW, C); channels land on the lane axis.
    x = jnp.transpose(x_nchw, (0, 2, 3, 1)).reshape(B, HW, C).astype(jnp.float32)

    vmem_bytes = 48 * 1024 * 1024   # fits v5e/v6e (128 MiB) and v7x (64 MiB)
    const2d = lambda shape: pl.BlockSpec(shape, lambda b: (0, 0))

    # ---------------- Stage 1: GroupNorm + fused QKV ----------------
    q, k, v = pl.pallas_call(
        groupnorm_qkv_kernel,
        out_shape=(jax.ShapeDtypeStruct((B, HW, C), jnp.bfloat16),) * 3,
        grid_spec=pltpu.PrefetchScalarGridSpec(
            num_scalar_prefetch=0,
            grid=(B,),
            in_specs=[
                pl.BlockSpec((1, HW, C), lambda b: (b, 0, 0)),   # x
                const2d((C, G)),                                 # group matrix
                const2d((1, C)), const2d((1, C)),                # gamma, beta
                const2d((C, 3 * C)), const2d((1, 3 * C)),        # W_qkv^T, b_qkv
            ],
            out_specs=[pl.BlockSpec((1, HW, C), lambda b: (b, 0, 0))] * 3,
        ),
        compiler_params=pltpu.CompilerParams(
            dimension_semantics=("parallel",),
            vmem_limit_bytes=vmem_bytes),
        cost_estimate=pl.CostEstimate(
            flops=2 * B * HW * C * 3 * C,
            transcendentals=0,
            bytes_accessed=B * HW * C * 4 + 3 * B * HW * C * 2 + C * 3 * C * 2),
    )(x, params["gmat"], params["gamma"], params["beta"],
      params["w_qkv_t"], params["b_qkv"])

    # ---------------- Stage 2: flash attention + proj + residual ----------------
    out = pl.pallas_call(
        flash_attn_kernel,
        out_shape=jax.ShapeDtypeStruct((B, HW, C), jnp.float32),
        grid_spec=pltpu.PrefetchScalarGridSpec(
            num_scalar_prefetch=0,
            grid=(B, nq, nk),
            in_specs=[
                pl.BlockSpec((1, tq, C), lambda b, qi, ki: (b, qi, 0)),  # x (residual)
                pl.BlockSpec((1, tq, C), lambda b, qi, ki: (b, qi, 0)),  # q
                pl.BlockSpec((1, tk, C), lambda b, qi, ki: (b, ki, 0)),  # k
                pl.BlockSpec((1, tk, C), lambda b, qi, ki: (b, ki, 0)),  # v
                pl.BlockSpec((C, C), lambda b, qi, ki: (0, 0)),          # Wp^T (bf16)
                pl.BlockSpec((1, C), lambda b, qi, ki: (0, 0)),          # bp
            ],
            out_specs=pl.BlockSpec((1, tq, C), lambda b, qi, ki: (b, qi, 0)),
            scratch_shapes=[
                pltpu.VMEM((tq, 1), jnp.float32),   # running max
                pltpu.VMEM((tq, 1), jnp.float32),   # running denom
                pltpu.VMEM((tq, C), jnp.float32),   # output accumulator
            ],
        ),
        compiler_params=pltpu.CompilerParams(
            dimension_semantics=("parallel", "parallel", "arbitrary"),
            vmem_limit_bytes=vmem_bytes),
        cost_estimate=pl.CostEstimate(
            flops=B * (4 * HW * HW * C + 2 * HW * C * C),
            transcendentals=B * HW * HW,
            bytes_accessed=(2 * B * HW * C * 4            # x in, out
                            + B * HW * C * 2              # q
                            + 2 * nq * B * HW * C * 2     # k, v re-streamed per q tile
                            + C * C * 2)),
    )(x, q, k, v, params["wp_t"], params["bp"])

    # (B, HW, C) -> NCHW
    return jnp.transpose(out.reshape(B, H, W, C), (0, 3, 1, 2))


# ----------------------------------------------------------------------------
# Deterministic parameter initialization (mirrors AttnBlock.initialize()).
# ----------------------------------------------------------------------------
def init_params(key, in_ch, num_groups=32):
    def xavier_uniform(k, fan_in, fan_out, gain=1.0):
        bound = gain * math.sqrt(6.0 / (fan_in + fan_out))
        return jax.random.uniform(k, (fan_out, fan_in), jnp.float32, -bound, bound)

    kq, kk, kv, kp = jax.random.split(key, 4)
    # Conv2d(in_ch, in_ch, 1): weight (C_out, C_in, 1, 1) -> (C_out, C_in).
    wq = xavier_uniform(kq, in_ch, in_ch)
    wk = xavier_uniform(kk, in_ch, in_ch)
    wv = xavier_uniform(kv, in_ch, in_ch)
    wp = xavier_uniform(kp, in_ch, in_ch, gain=1e-5)

    cg = in_ch // num_groups
    gmat = jnp.zeros((in_ch, num_groups), jnp.float32).at[
        jnp.arange(in_ch), jnp.arange(in_ch) // cg].set(1.0)

    return {
        "gmat": gmat,
        "gamma": jnp.ones((1, in_ch), jnp.float32),
        "beta": jnp.zeros((1, in_ch), jnp.float32),
        # fused, transposed (C_in, 3*C_out) QKV weight, stored bf16 for the MXU
        "w_qkv_t": jnp.concatenate([wq.T, wk.T, wv.T], axis=1).astype(jnp.bfloat16),
        "b_qkv": jnp.zeros((1, 3 * in_ch), jnp.float32),
        "wp_t": wp.T.astype(jnp.bfloat16),
        "bp": jnp.zeros((1, in_ch), jnp.float32),
    }


# ----------------------------------------------------------------------------
# Pure-JAX f32 reference (same weights, canonical math) for correctness check.
# ----------------------------------------------------------------------------
def attn_block_ref(x_nchw, params, num_groups=32):
    B, C, H, W = x_nchw.shape
    x = x_nchw.astype(jnp.float32)
    xg = x.reshape(B, num_groups, C // num_groups, H, W)
    mean = xg.mean(axis=(2, 3, 4), keepdims=True)
    var = ((xg - mean) ** 2).mean(axis=(2, 3, 4), keepdims=True)
    h = ((xg - mean) / jnp.sqrt(var + 1e-5)).reshape(B, C, H, W)
    h = h * params["gamma"].reshape(1, C, 1, 1) + params["beta"].reshape(1, C, 1, 1)

    hf = jnp.transpose(h, (0, 2, 3, 1)).reshape(B, H * W, C)
    qkv = hf @ params["w_qkv_t"].astype(jnp.float32) + params["b_qkv"]
    q, k, v = qkv[..., :C], qkv[..., C:2 * C], qkv[..., 2 * C:]
    w = jnp.einsum("bqc,bkc->bqk", q, k) * float(C) ** (-0.5)
    w = jax.nn.softmax(w, axis=-1)
    a = jnp.einsum("bqk,bkc->bqc", w, v)
    proj = a @ params["wp_t"].astype(jnp.float32) + params["bp"]
    proj = jnp.transpose(proj.reshape(B, H, W, C), (0, 3, 1, 2))
    return x + proj


if __name__ == "__main__":
    key = jax.random.PRNGKey(0)
    kx, kp = jax.random.split(key)

    # GroupNorm(32, C) requires C % 32 == 0 -> use C=64 at small spatial sizes.
    B, C, H, W = 2, 64, 8, 8
    x = jax.random.normal(kx, (B, C, H, W), jnp.float32)
    params = init_params(kp, C, num_groups=32)

    y = jax.block_until_ready(attn_block(x, params))
    y_ref = attn_block_ref(x, params)
    assert y.shape == (B, C, H, W)
    assert jnp.allclose(y, y_ref, atol=2e-4, rtol=2e-4), (
        float(jnp.max(jnp.abs(y - y_ref))))

    # Exercise the multi-tile online-softmax path (nq=2, nk=2).
    B2, C2, H2, W2 = 2, 64, 16, 16
    x2 = jax.random.normal(kx, (B2, C2, H2, W2), jnp.float32)
    y2 = jax.block_until_ready(attn_block(x2, params, tq=128, tk=128))
    y2_ref = attn_block_ref(x2, params)
    assert y2.shape == (B2, C2, H2, W2)
    assert jnp.allclose(y2, y2_ref, atol=2e-4, rtol=2e-4), (
        float(jnp.max(jnp.abs(y2 - y2_ref))))

    print("KERNEL_OK")
</pallas_src>

<mosaic_0001>
module attributes {stable_mosaic.version = 11 : i64} {
  func.func @groupnorm_qkv_kernel(%arg0: i32, %arg1: memref<1x64x64xf32, #tpu.memory_space<vmem>>, %arg2: memref<64x32xf32, #tpu.memory_space<vmem>>, %arg3: memref<1x64xf32, #tpu.memory_space<vmem>>, %arg4: memref<1x64xf32, #tpu.memory_space<vmem>>, %arg5: memref<64x192xbf16, #tpu.memory_space<vmem>>, %arg6: memref<1x192xf32, #tpu.memory_space<vmem>>, %arg7: memref<1x64x64xbf16, #tpu.memory_space<vmem>>, %arg8: memref<1x64x64xbf16, #tpu.memory_space<vmem>>, %arg9: memref<1x64x64xbf16, #tpu.memory_space<vmem>>) attributes {dimension_semantics = [#tpu.dimension_semantics<parallel>], iteration_bounds = array<i64: 2>, scalar_prefetch = 0 : i64, scratch_operands = 0 : i64, tpu.core_type = #tpu.core_type<tc>, window_params = [{transform_indices = @transform_0, window_bounds = array<i64: 1, 64, 64>}, {pipeline_mode = #tpu.pipeline_mode<synchronous>, transform_indices = @transform_1, window_bounds = array<i64: 64, 32>}, {pipeline_mode = #tpu.pipeline_mode<synchronous>, transform_indices = @transform_2, window_bounds = array<i64: 1, 64>}, {pipeline_mode = #tpu.pipeline_mode<synchronous>, transform_indices = @transform_3, window_bounds = array<i64: 1, 64>}, {pipeline_mode = #tpu.pipeline_mode<synchronous>, transform_indices = @transform_4, window_bounds = array<i64: 64, 192>}, {pipeline_mode = #tpu.pipeline_mode<synchronous>, transform_indices = @transform_5, window_bounds = array<i64: 1, 192>}, {transform_indices = @transform_6, window_bounds = array<i64: 1, 64, 64>}, {transform_indices = @transform_7, window_bounds = array<i64: 1, 64, 64>}, {transform_indices = @transform_8, window_bounds = array<i64: 1, 64, 64>}]} {
    %c0 = arith.constant 0 : index
    %c0_0 = arith.constant 0 : index
    %c0_1 = arith.constant 0 : index
    %0 = vector.load %arg1[%c0, %c0_0, %c0_1] : memref<1x64x64xf32, #tpu.memory_space<vmem>>, vector<1x64x64xf32>
    %1 = vector.shape_cast %0 : vector<1x64x64xf32> to vector<64x64xf32>
    %c0_2 = arith.constant 0 : index
    %c0_3 = arith.constant 0 : index
    %2 = vector.load %arg2[%c0_2, %c0_3] : memref<64x32xf32, #tpu.memory_space<vmem>>, vector<64x32xf32>
    %cst = arith.constant dense<0.000000e+00> : vector<64xf32>
    %3 = vector.multi_reduction <add>, %1, %cst [0] : vector<64x64xf32> to vector<64xf32>
    %4 = vector.shape_cast %3 : vector<64xf32> to vector<1x64xf32>
    %cst_4 = arith.constant dense<0.000000e+00> : vector<1x32xf32>
    %5 = tpu.matmul %4, %2, %cst_4 {dimension_numbers = #tpu.dot_dimension_numbers<[1], [0], [0], [1], [0, 0, 1, 1], [], []>} : vector<1x64xf32>, vector<64x32xf32>, vector<1x32xf32> -> vector<1x32xf32>
    %cst_5 = arith.constant 1.280000e+02 : f32
    %6 = vector.broadcast %cst_5 : f32 to vector<1x32xf32>
    %7 = arith.divf %5, %6 : vector<1x32xf32>
    %cst_6 = arith.constant dense<0.000000e+00> : vector<1x64xf32>
    %8 = tpu.matmul %7, %2, %cst_6 {dimension_numbers = #tpu.dot_dimension_numbers<[1], [1], [0], [0], [0, 0, 1, 0], [], []>} : vector<1x32xf32>, vector<64x32xf32>, vector<1x64xf32> -> vector<1x64xf32>
    %9 = vector.broadcast %8 : vector<1x64xf32> to vector<64x64xf32>
    %10 = arith.subf %1, %9 : vector<64x64xf32>
    %11 = arith.mulf %10, %10 : vector<64x64xf32>
    %cst_7 = arith.constant dense<0.000000e+00> : vector<64xf32>
    %12 = vector.multi_reduction <add>, %11, %cst_7 [0] : vector<64x64xf32> to vector<64xf32>
    %13 = vector.shape_cast %12 : vector<64xf32> to vector<1x64xf32>
    %cst_8 = arith.constant dense<0.000000e+00> : vector<1x32xf32>
    %14 = tpu.matmul %13, %2, %cst_8 {dimension_numbers = #tpu.dot_dimension_numbers<[1], [0], [0], [1], [0, 0, 1, 1], [], []>} : vector<1x64xf32>, vector<64x32xf32>, vector<1x32xf32> -> vector<1x32xf32>
    %cst_9 = arith.constant 1.280000e+02 : f32
    %15 = vector.broadcast %cst_9 : f32 to vector<1x32xf32>
    %16 = arith.divf %14, %15 : vector<1x32xf32>
    %cst_10 = arith.constant dense<0.000000e+00> : vector<1x64xf32>
    %17 = tpu.matmul %16, %2, %cst_10 {dimension_numbers = #tpu.dot_dimension_numbers<[1], [1], [0], [0], [0, 0, 1, 0], [], []>} : vector<1x32xf32>, vector<64x32xf32>, vector<1x64xf32> -> vector<1x64xf32>
    %cst_11 = arith.constant 9.99999974E-6 : f32
    %18 = vector.broadcast %cst_11 : f32 to vector<1x64xf32>
    %19 = arith.addf %17, %18 : vector<1x64xf32>
    %20 = math.rsqrt %19 : vector<1x64xf32>
    %21 = vector.broadcast %20 : vector<1x64xf32> to vector<64x64xf32>
    %22 = arith.mulf %10, %21 : vector<64x64xf32>
    %c0_12 = arith.constant 0 : index
    %c0_13 = arith.constant 0 : index
    %23 = vector.load %arg3[%c0_12, %c0_13] : memref<1x64xf32, #tpu.memory_space<vmem>>, vector<1x64xf32>
    %24 = vector.broadcast %23 : vector<1x64xf32> to vector<64x64xf32>
    %25 = arith.mulf %22, %24 : vector<64x64xf32>
    %c0_14 = arith.constant 0 : index
    %c0_15 = arith.constant 0 : index
    %26 = vector.load %arg4[%c0_14, %c0_15] : memref<1x64xf32, #tpu.memory_space<vmem>>, vector<1x64xf32>
    %27 = vector.broadcast %26 : vector<1x64xf32> to vector<64x64xf32>
    %28 = arith.addf %25, %27 : vector<64x64xf32>
    %29 = arith.truncf %28 : vector<64x64xf32> to vector<64x64xbf16>
    %c0_16 = arith.constant 0 : index
    %c0_17 = arith.constant 0 : index
    %30 = vector.load %arg5[%c0_16, %c0_17] : memref<64x192xbf16, #tpu.memory_space<vmem>>, vector<64x192xbf16>
    %cst_18 = arith.constant dense<0.000000e+00> : vector<64x192xf32>
    %31 = tpu.matmul %29, %30, %cst_18 {dimension_numbers = #tpu.dot_dimension_numbers<[1], [0], [0], [1], [0, 0, 1, 1], [], []>} : vector<64x64xbf16>, vector<64x192xbf16>, vector<64x192xf32> -> vector<64x192xf32>
    %c0_19 = arith.constant 0 : index
    %c0_20 = arith.constant 0 : index
    %32 = vector.load %arg6[%c0_19, %c0_20] : memref<1x192xf32, #tpu.memory_space<vmem>>, vector<1x192xf32>
    %33 = vector.broadcast %32 : vector<1x192xf32> to vector<64x192xf32>
    %34 = arith.addf %31, %33 : vector<64x192xf32>
    %35 = vector.extract_strided_slice %34 {offsets = [0, 0], sizes = [64, 64], strides = [1, 1]} : vector<64x192xf32> to vector<64x64xf32>
    %cst_21 = arith.constant 1.250000e-01 : f32
    %36 = vector.broadcast %cst_21 : f32 to vector<64x64xf32>
    %37 = arith.mulf %35, %36 : vector<64x64xf32>
    %38 = arith.truncf %37 : vector<64x64xf32> to vector<64x64xbf16>
    %c0_22 = arith.constant 0 : index
    %c0_23 = arith.constant 0 : index
    %c0_24 = arith.constant 0 : index
    %39 = vector.load %arg7[%c0_22, %c0_23, %c0_24] : memref<1x64x64xbf16, #tpu.memory_space<vmem>>, vector<1x64x64xbf16>
    %40 = vector.shape_cast %39 : vector<1x64x64xbf16> to vector<64x64xbf16>
    %41 = vector.shape_cast %38 : vector<64x64xbf16> to vector<1x64x64xbf16>
    tpu.vector_store %arg7[%c0_22, %c0_23, %c0_24], %41 {strides = array<i32>} : memref<1x64x64xbf16, #tpu.memory_space<vmem>>, vector<1x64x64xbf16>,
    %42 = vector.extract_strided_slice %34 {offsets = [0, 64], sizes = [64, 64], strides = [1, 1]} : vector<64x192xf32> to vector<64x64xf32>
    %43 = arith.truncf %42 : vector<64x64xf32> to vector<64x64xbf16>
    %c0_25 = arith.constant 0 : index
    %c0_26 = arith.constant 0 : index
    %c0_27 = arith.constant 0 : index
    %44 = vector.load %arg8[%c0_25, %c0_26, %c0_27] : memref<1x64x64xbf16, #tpu.memory_space<vmem>>, vector<1x64x64xbf16>
    %45 = vector.shape_cast %44 : vector<1x64x64xbf16> to vector<64x64xbf16>
    %46 = vector.shape_cast %43 : vector<64x64xbf16> to vector<1x64x64xbf16>
    tpu.vector_store %arg8[%c0_25, %c0_26, %c0_27], %46 {strides = array<i32>} : memref<1x64x64xbf16, #tpu.memory_space<vmem>>, vector<1x64x64xbf16>,
    %47 = vector.extract_strided_slice %34 {offsets = [0, 128], sizes = [64, 64], strides = [1, 1]} : vector<64x192xf32> to vector<64x64xf32>
    %48 = arith.truncf %47 : vector<64x64xf32> to vector<64x64xbf16>
    %c0_28 = arith.constant 0 : index
    %c0_29 = arith.constant 0 : index
    %c0_30 = arith.constant 0 : index
    %49 = vector.load %arg9[%c0_28, %c0_29, %c0_30] : memref<1x64x64xbf16, #tpu.memory_space<vmem>>, vector<1x64x64xbf16>
    %50 = vector.shape_cast %49 : vector<1x64x64xbf16> to vector<64x64xbf16>
    %51 = vector.shape_cast %48 : vector<64x64xbf16> to vector<1x64x64xbf16>
    tpu.vector_store %arg9[%c0_28, %c0_29, %c0_30], %51 {strides = array<i32>} : memref<1x64x64xbf16, #tpu.memory_space<vmem>>, vector<1x64x64xbf16>,
    return
  }
  func.func @transform_0(%arg0: i32) -> (i32, i32, i32) {
    %c0_i32 = arith.constant 0 : i32
    %c0_i32_0 = arith.constant 0 : i32
    %c0_i32_1 = arith.constant 0 : i32
    return %arg0, %c0_i32, %c0_i32_0 : i32, i32, i32
  }
  func.func @transform_1(%arg0: i32) -> (i32, i32) {
    %c0_i32 = arith.constant 0 : i32
    %c0_i32_0 = arith.constant 0 : i32
    %c0_i32_1 = arith.constant 0 : i32
    return %c0_i32, %c0_i32_0 : i32, i32
  }
  func.func @transform_2(%arg0: i32) -> (i32, i32) {
    %c0_i32 = arith.constant 0 : i32
    %c0_i32_0 = arith.constant 0 : i32
    %c0_i32_1 = arith.constant 0 : i32
    return %c0_i32, %c0_i32_0 : i32, i32
  }
  func.func @transform_3(%arg0: i32) -> (i32, i32) {
    %c0_i32 = arith.constant 0 : i32
    %c0_i32_0 = arith.constant 0 : i32
    %c0_i32_1 = arith.constant 0 : i32
    return %c0_i32, %c0_i32_0 : i32, i32
  }
  func.func @transform_4(%arg0: i32) -> (i32, i32) {
    %c0_i32 = arith.constant 0 : i32
    %c0_i32_0 = arith.constant 0 : i32
    %c0_i32_1 = arith.constant 0 : i32
    return %c0_i32, %c0_i32_0 : i32, i32
  }
  func.func @transform_5(%arg0: i32) -> (i32, i32) {
    %c0_i32 = arith.constant 0 : i32
    %c0_i32_0 = arith.constant 0 : i32
    %c0_i32_1 = arith.constant 0 : i32
    return %c0_i32, %c0_i32_0 : i32, i32
  }
  func.func @transform_6(%arg0: i32) -> (i32, i32, i32) {
    %c0_i32 = arith.constant 0 : i32
    %c0_i32_0 = arith.constant 0 : i32
    %c0_i32_1 = arith.constant 0 : i32
    return %arg0, %c0_i32, %c0_i32_0 : i32, i32, i32
  }
  func.func @transform_7(%arg0: i32) -> (i32, i32, i32) {
    %c0_i32 = arith.constant 0 : i32
    %c0_i32_0 = arith.constant 0 : i32
    %c0_i32_1 = arith.constant 0 : i32
    return %arg0, %c0_i32, %c0_i32_0 : i32, i32, i32
  }
  func.func @transform_8(%arg0: i32) -> (i32, i32, i32) {
    %c0_i32 = arith.constant 0 : i32
    %c0_i32_0 = arith.constant 0 : i32
    %c0_i32_1 = arith.constant 0 : i32
    return %arg0, %c0_i32, %c0_i32_0 : i32, i32, i32
  }
}

</mosaic_0001>

<bundles_post_ra>
// kernel: tpu_custom_call.1
= control target key start
LH: loop header
LB: loop body
LE: loop exit
PB: predicated region body
PF: predicated region fallthrough
CT: control target
= control target key end

     0   :  { %s2393_s0 = inlined_call_operand.hbm [shape: f32[2,64,64], index: 0, kind: input, shape index: {}]   ;;  %s2394_s1 = inlined_call_operand.vmem [shape: f32[64,32], index: 1, kind: input, shape index: {}]   ;;  %s2395_s2 = inlined_call_operand.vmem [shape: f32[1,64], index: 2, kind: input, shape index: {}]   ;;  %s2396_s3 = inlined_call_operand.vmem [shape: f32[1,64], index: 3, kind: input, shape index: {}]   ;;  %s2397_s4 = inlined_call_operand.vmem [shape: bf16[64,192], index: 4, kind: input, shape index: {}]   ;;  %s2398_s5 = inlined_call_operand.vmem [shape: f32[1,192], index: 5, kind: input, shape index: {}]   ;;  %s2399_s6 = inlined_call_operand.hbm [shape: bf16[2,64,64], index: 6, kind: output, shape index: {0}]   ;;  %s2400_s7 = inlined_call_operand.hbm [shape: bf16[2,64,64], index: 7, kind: output, shape index: {1}]   ;;  %s2401_s8 = inlined_call_operand.hbm [shape: bf16[2,64,64], index: 8, kind: output, shape index: {2}]  }
   0x1   :  { %2406 = sst [smem:[#allocation12_spill]] %s2393_s0 }
   0x2   :  { %2407 = sst [smem:[#allocation13_spill]] %s2394_s1 }
   0x3   :  { %14 = vsyncpa [#allocation3], 0 }
   0x4   :  { %16 = vsyncpa [#allocation3 + $0x1], 0 }
   0x5   :  { %17 = vsyncpa [#allocation4], 0 }
   0x6   :  { %19 = vsyncpa [#allocation4 + $0x1], 0 }
   0x7   :  { %20 = vsyncpa [#allocation7], 0 }
   0x8   :  { %22 = vsyncpa [#allocation7 + $0x1], 0  ;;  %s1838_s27 = smov 0   ;;  %s1840_s28 = smov 0  }
   0x9   :  { %s1842_s29 = smov 0   ;;  %s1844_s30 = smov 0  }
   0xa LB: > { %s1859_s9 = sadd.s32 4294967295, %s1779_s30   ;;  %s2403_s10 = sadd.s32 4294967294, %s1779_s30   ;;  %s1779_s30 = sphi %s1844_s30, %s2426_s30   ;;  %s1775_s29 = sphi %s1842_s29, %s2425_s29   ;;  %s1771_s28 = sphi %s1840_s28, %s2424_s28   ;;  %s1767_s27 = sphi %s1838_s27, %s2423_s27  }
   0xb   : > { %s1863_s11 = sadd.s32 1, %s1779_s30   ;;  %s35_s12 = sadd.s32 1, %s1775_s29 }
   0xc   : > { %s32_s13 = ssub.s32 %s1779_s30, %s1863_s11  ;;  %p42_p0 = scmp.ne.s32.totalorder %s1775_s29, %s1771_s28 }
   0xd   : > { %p33_p1 = scmp.eq.s32.totalorder %s32_s13, 0  ;;  %p43_p2 = scmp.eq.s32.totalorder %s1779_s30, 0 }
   0xe   : > { %p48_p3 = scmp.ne.s32.totalorder %s1771_s28, %s1767_s27  ;;  %p49_p4 = scmp.eq.s32.totalorder %s1859_s9, 0 }
   0xf   : > { %s1875_s14 = scalar_select %p33_p1, %s1775_s29, %s35_s12  }
  0x10   : > { %p1877_p5 = por %p43_p2, %p42_p0  ;;  %p1881_p6 = por %p49_p4, %p48_p3 }
  0x11   : > { %p177_p7 = scmp.eq.s32.totalorder %s1859_s9, 1  ;;  %p183_p8 = scmp.eq.s32.totalorder %s2403_s10, 1 }
  0x12   : > { %p1567_p10 = scmp.lt.s32.totalorder %s1779_s30, 2  ;;  %s270_s19 = sand.u32 1, %s1775_s29  }
  0x13   : > { %p1890_p11 = por %p177_p7, %p42_p0  ;;  %p1894_p12 = por %p183_p8, %p48_p3 }
  0x14   : > { %s1349_s20 = sshll.u32 %s1779_s30, 10  ;;  %s1272_s21 = sshll.u32 %s270_s19, 6 }
  0x15   : > { %s2410_s17 = scalar_select %p1890_p11, 1, 0 }
  0x16   : > { %s2411_s18 = scalar_select %p1894_p12, 1, 0 }
  0x17   : > { %s2412_s0 = sld [smem:[#allocation12_spill]]  ;;  %s274_s25 = scalar_lea.vmem [#allocation2], %s1272_s21 }
  0x18   : > { %s281_s26 = sshll.u32 %s274_s25, 4  ;;  %p1907_p13 = pnand %p1567_p10, %p1877_p5  ;;  %s1911_s26 = int_to_ptr.vmem [resolvable:$true] %s281_s26 }
  0x19   : > { %s1913_s13 = scalar_lea.sflag [#allocation3], %s270_s19 }
  0x1a   : > { %p1625_p1 = pneg %p1907_p13 }
  0x1d   : > { %s1903_s24 = scalar_lea.hbm %s2412_s0, %s1349_s20  ;;  %s1628_s21 = scalar_lea.hbm %s2412_s0, 2048 }
  0x1e   : > { %s1623_s22 = scalar_lea.hbm %s1903_s24, 1024  ;;  %p1629_p4 = scmp.lt.u32.totalorder %s1903_s24, %s2412_s0 }
  0x1f   : > { %p1624_p0 = scmp.ne.s32.totalorder %s1903_s24, %s1623_s22  ;;  %p1630_p5 = scmp.lt.u32.totalorder %s1628_s21, %s1623_s22 }
  0x20   : > { %p1632_p8 = scmp.lt.u32.totalorder %s1623_s22, %s1903_s24 }
  0x21   : > { %p1626_p2 = pnand %p1625_p1, %p1624_p0  ;;  %p1631_p7 = por %p1630_p5, %p1629_p4 }
  0x23   : > { %p1627_p3 = pneg %p1626_p2  ;;  %p1633_p10 = por %p1632_p8, %p1631_p7 }
  0x25   : > { %p1634_p9 = pnand %p1633_p10, %p1627_p3 }
  0x27   : > { %1637 = shalt.err (!%p1634_p9)
}
  0x28   : > { %s1638_s19 = scalar_lea.vmem %s1911_s26, 1024  ;;  %s1781_s20 = smov [#allocation2]  }
  0x29   : > { %p1639_p0 = scmp.ne.s32.totalorder %s1911_s26, %s1638_s19  ;;  %s1643_s15 = sshll.u32 %s1781_s20, 4  ;;  %s1644_s15 = int_to_ptr.vmem [resolvable:$false] %s1643_s15 }
  0x2a   : > { %s1645_s23 = scalar_lea.vmem %s1644_s15, 2048  ;;  %p1646_p11 = scmp.lt.s32.totalorder %s1911_s26, %s1644_s15 }
  0x2b   : > { %p1641_p2 = pnand %p1639_p0, %p1625_p1  ;;  %p1647_p4 = scmp.lt.s32.totalorder %s1645_s23, %s1638_s19 }
  0x2d   : > { %p1642_p12 = pneg %p1641_p2  ;;  %p1648_p5 = por %p1647_p4, %p1646_p11 }
  0x2f   : > { %p1649_p7 = pnand %p1648_p5, %p1642_p12 }
  0x31   : > { %1652 = shalt.err (!%p1649_p7)
}
  0x32   : > { %s1782_s22 = smov 128   ;;  %s1783_s21 = smov 8  }
  0x33   : > { %1556 = dma.hbm_to_vmem [thread:$0]  (!%p1907_p13), %s1903_s24, 1024, %s1911_s26, %s1913_s13, %s1782_s22, %s1782_s22, %s1783_s21  }
  0x34   : > { %p1275_p9 = scmp.ge.s32.totalorder %s1779_s30, 1  ;;  %p289_p1 = scmp.lt.s32.totalorder %s1779_s30, 3 }
  0x36   : > { %p290_p3 = pnand %p1275_p9, %p289_p1 }
  0x37   : > { %s1944_s25 = sand.u32 (!%p290_p3), 1, %s1771_s28  }
  0x38   : > { %293 = sbr.rel (%p290_p3) target bundleno = 1394 (0x572), region = 44  ;;  %s1276_s19 = sshll.u32 (!%p290_p3), %s1944_s25, 6 }
  0x39   : > { %s296_s20 = scalar_lea.sflag (!%p290_p3), [#allocation3], %s1944_s25  ;;  %s1948_s15 = scalar_lea.vmem (!%p290_p3), [#allocation2], %s1276_s19 }
  0x3f   : > { %1754 = dma.done.wait (%p1881_p6), %s296_s20, 1024  }
  0x40   : > { %1756 = vsyncadd (%p1881_p6), %s296_s20, 4294966272  ;;  %v1784_v0 = vmov 0.0|0.0   ;;  %vm1785_vm0 = vmmov 0   ;;  %v1786_v1 = vmov 0.0   ;;  %vm456_vm1 = vcmask 261120   ;;  %s2416_s1 = sld [smem:[#allocation13_spill]] }
  0x41   : > { %1489 = vmatprep.subr.bf16.mxu0 %v1784_v0  ;;  %1429 = vmatprep.mubr.msk.f32.mxu0 %vm1785_vm0, %v1786_v1  ;;  %vm1962_vm2 = vmpackc.low %vm456_vm1, %vm456_vm1  ;;  %vm359_vm3 = vcmask 523264   ;;  %v1981_v8 = vld [vmem:[%s1948_s15] sm:$0xff]  ;;  %v1987_v10 = vld [vmem:[%s1948_s15 + $0x8] sm:$0xff]  ;;  %v554_v47 = vlaneseq  ;;  %vm974_vm4 = vcmask 519168   ;;  %s2404_s22 = smov 64   ;;  %s2246_s20 = sshll.u32 %s1859_s9, 9 }
  0x42   : > { %1501 = vmatprep.subr.bf16.mxu1 %v1784_v0  ;;  %1448 = vmatprep.mubr.msk.f32.mxu1 %vm1785_vm0, %v1786_v1  ;;  %v1990_v11 = vld [vmem:[%s1948_s15 + $0x10] sm:$0xff]  ;;  %v1993_v12 = vld [vmem:[%s1948_s15 + $0x18] sm:$0xff]  ;;  %v360_v13 = vsel %vm359_vm3, %v1981_v8, 0.0  ;;  %v2008_v16 = vld [vmem:[%s1948_s15 + $0x20] sm:$0xff]  ;;  %v361_v17 = vsel %vm359_vm3, %v1987_v10, 0.0  ;;  %s2259_s12 = scalar_lea.hbm %s2399_s6, %s2246_s20  ;;  %p2417_p11 = scmp.ne.s32.totalorder %s2410_s17, 0 }
  0x43   : > { %v363_v18 = vsel %vm359_vm3, %v1990_v11, 0.0  ;;  %v2016_v19 = vld [vmem:[%s1948_s15 + $0x28] sm:$0xff]  ;;  %v362_v20 = vadd.f32 %v361_v17, %v360_v13  ;;  %v365_v21 = vsel %vm359_vm3, %v1993_v12, 0.0  ;;  %v367_v26 = vsel %vm359_vm3, %v2008_v16, 0.0  ;;  %v349_v27 = vld [vmem:[%s1948_s15 + $0x30] sm:$0xff]  ;;  %v350_v31 = vld [vmem:[%s1948_s15 + $0x38] sm:$0xff] }
  0x44   : > { %v369_v29 = vsel %vm359_vm3, %v2016_v19, 0.0  ;;  %v371_v33 = vsel %vm359_vm3, %v349_v27, 0.0  ;;  %v373_v35 = vsel %vm359_vm3, %v350_v31, 0.0  ;;  %v2067_v48 = vshrl.u32 %v554_v47, 7  ;;  %v1612_v2 = vld [vmem:[%s2397_s4 + $0x10] ss:$8 sps:$4 sm:$0xff]  }
  0x45   : > { %v364_v23 = vadd.f32 %v363_v18, %v362_v20  ;;  %s2191_s15 = sshll.u32 %s1944_s25, 5  ;;  %s1789_s10 = smov [#allocation5]  }
  0x46   : > { %v351_v3 = vld [vmem:[%s2416_s1] sm:$0xff]  ;;  %v352_v4 = vld [vmem:[%s2416_s1 + $0x8] sm:$0xff]  ;;  %v353_v5 = vld [vmem:[%s2416_s1 + $0x10] sm:$0xff]  ;;  %v2070_v49 = vsub.s32 0, %v2067_v48  ;;  %s2199_s21 = scalar_lea.vmem [#allocation8], %s2191_s15  ;;  %s2204_s19 = scalar_lea.vmem [#allocation5], %s2191_s15 }
  0x47   : > { %v1975_v6 = vpack.c.bf16 %v352_v4, %v351_v3  ;;  %v354_v7 = vld [vmem:[%s2416_s1 + $0x18] sm:$0xff]  ;;  %v355_v14 = vld [vmem:[%s2416_s1 + $0x20] sm:$0xff]  ;;  %v356_v15 = vld [vmem:[%s2416_s1 + $0x28] sm:$0xff]  ;;  %v366_v28 = vadd.f32 %v365_v21, %v364_v23  ;;  %s1103_s16 = sshll.u32 %s2204_s19, 4  ;;  %s2261_s16 = int_to_ptr.vmem [resolvable:$true] %s1103_s16 }
  0x48   : > { %v1984_v9 = vpack.c.bf16 %v354_v7, %v353_v5  ;;  %v2021_v22 = vpack.c.bf16 %v356_v15, %v355_v14  ;;  %v357_v24 = vld [vmem:[%s2416_s1 + $0x30] sm:$0xff]  ;;  %v358_v25 = vld [vmem:[%s2416_s1 + $0x38] sm:$0xff]  ;;  %s1653_s23 = scalar_lea.vmem %s2261_s16, 512 }
  0x49   : > { %1491 = vmatpush3.bf16.msra.mxu0 %v1975_v6  ;;  %1504 = vmatpush3.bf16.xpose.msk.msra.mxu1 %vm1962_vm2, %v1975_v6  ;;  %v2036_v30 = vpack.c.bf16 %v358_v25, %v357_v24  ;;  %v368_v32 = vadd.f32 %v367_v26, %v366_v28  ;;  %p1654_p6 = scmp.ne.s32.totalorder %s2261_s16, %s1653_s23 }
  0x4a   : > { %1492 = vmatprep.subr.bf16.mxu0 %v1784_v0  ;;  %1505 = vmatprep.subr.bf16.mxu1 %v1784_v0 }
  0x4b   : > { %v370_v34 = vadd.f32 %v369_v29, %v368_v32  ;;  %p1655_p12 = pnand %p1654_p6, %p2417_p11 }
  0x4d   : > { %1494 = vmatpush3.bf16.msra.mxu0 %v1984_v9  ;;  %v372_v36 = vadd.f32 %v371_v33, %v370_v34  ;;  %v1609_v34 = vld [vmem:[%s2397_s4] ss:$8 sps:$4 sm:$0xff]   ;;  %p1656_p13 = pneg %p1655_p12 }
  0x4e   : > { %1495 = vmatprep.subr.bf16.mxu0 %v1784_v0 }
  0x4f   : > { %v374_v37 = vadd.f32 %v373_v35, %v372_v36  ;;  %v1620_v35 = vld [vmem:[%s2397_s4 + $0x34] ss:$8 sps:$4 sm:$0xff]   ;;  %v1787_v36 = vmov 0  }
  0x51   : > { %1497 = vmatpush3.bf16.msra.mxu0 %v2021_v22  ;;  %1508 = vmatpush3.bf16.xpose.msk.msra.mxu1 %vm1962_vm2, %v1984_v9  ;;  %v375_v38 = vrot.slane %v374_v37, 4 }
  0x52   : > { %1498 = vmatprep.subr.bf16.mxu0 %v1784_v0  ;;  %1509 = vmatprep.subr.bf16.mxu1 %v1784_v0 }
  0x53   : > { %v376_v39 = vadd.f32 %v375_v38, %v374_v37  ;;  %v1618_v37 = vld [vmem:[%s2397_s4 + $0x30] ss:$8 sps:$4 sm:$0xff]  }
  0x55   : > { %1500 = vmatpush3.bf16.msra.mxu0 %v2036_v30  ;;  %v377_v40 = vrot.slane %v376_v39, 2 }
  0x56   : > { %1517 = vmatprep.subr.bf16.mxu0 %v1784_v0 }
  0x57   : > { %v378_v41 = vadd.f32 %v377_v40, %v376_v39 }
  0x59   : > { %1512 = vmatpush3.bf16.xpose.msk.msra.mxu1 %vm1962_vm2, %v2021_v22  ;;  %v379_v42 = vrot.slane %v378_v41, 1 }
  0x5a   : > { %1513 = vmatprep.subr.bf16.mxu1 %v1784_v0 }
  0x5b   : > { %v380_v43 = vadd.f32 %v379_v42, %v378_v41 }
  0x5d   : > { %1430 = vmatmul.mubr.msk.f32.vlgmr.msra.gmra.mrb[0].mxu0 %vm359_vm3, %v380_v43  ;;  %v1300_v43 = vld [vmem:[%s2395_s2] ss:$0 sm:$0xff] }
  0x5e   : > { %1519 = vmatpush3.bf16.msra.mxu0 %v1975_v6  ;;  %1467 = vmatprep.mubr.msk.f32.mxu0 %vm1785_vm0, %v1786_v1 }
  0x5f   : > { %1520 = vmatprep.subr.bf16.mxu0 %v1784_v0 }
  0x61   : > { %1516 = vmatpush3.bf16.xpose.msk.msra.mxu1 %vm1962_vm2, %v2036_v30 }
  0x62   : > { %1522 = vmatpush3.bf16.msra.mxu0 %v1984_v9 }
  0x63   : > { %1523 = vmatprep.subr.bf16.mxu0 %v1784_v0 }
  0x66   : > { %1525 = vmatpush3.bf16.msra.mxu0 %v2021_v22 }
  0x67   : > { %1526 = vmatprep.subr.bf16.mxu0 %v1784_v0 }
  0x6a   : > { %1528 = vmatpush3.bf16.msra.mxu0 %v2036_v30 }
  0x6b   : > { %1529 = vmatprep.subr.bf16.mxu0 %v1784_v0 }
 0x130   : > { %v450_v44 = vpop.f32.mrb[0].mxu0 }
 0x131   : > { %v455_v45 = vmul.f32 0.0078125, %v450_v44  ;;  %v1431_v46 = vpop.f32.mrb[1].mxu0 }
 0x132   : > { %v1301_v46 = vld [vmem:[%s2396_s3] ss:$0 sm:$0xff] }
 0x133   : > { %1449 = vmatmul.mubr.msk.f32.vlgmr.msra.gmra.mrb[0].mxu1 %vm456_vm1, %v455_v45 }
 0x134   : > { %893 = vmatprep.mubr.bf16.mxu1 %v1787_v36 }
 0x206   : > { %v550_v50 = vpop.f32.mrb[0].mxu1 }
 0x207   : > { %v557_v51 = vrot.slane %v550_v50, %v2070_v49  ;;  %v1450_v52 = vpop.f32.mrb[1].mxu1 }
 0x209   : > { %v2074_v53 = vsub.f32 %v1981_v8, %v557_v51  ;;  %v2077_v54 = vsub.f32 %v1987_v10, %v557_v51  ;;  %v2080_v55 = vsub.f32 %v1990_v11, %v557_v51  ;;  %v2083_v56 = vsub.f32 %v1993_v12, %v557_v51 }
 0x20a   : > { %v2086_v57 = vsub.f32 %v2008_v16, %v557_v51  ;;  %v2095_v61 = vsub.f32 %v2016_v19, %v557_v51  ;;  %v2101_v5 = vsub.f32 %v349_v27, %v557_v51  ;;  %v2106_v11 = vsub.f32 %v350_v31, %v557_v51 }
 0x20b   : > { %v566_v58 = vmul.f32 %v2074_v53, %v2074_v53  ;;  %v567_v59 = vmul.f32 %v2077_v54, %v2077_v54  ;;  %v568_v60 = vmul.f32 %v2080_v55, %v2080_v55  ;;  %v569_v62 = vmul.f32 %v2083_v56, %v2083_v56 }
 0x20c   : > { %v570_v7 = vmul.f32 %v2086_v57, %v2086_v57  ;;  %v571_v12 = vmul.f32 %v2095_v61, %v2095_v61  ;;  %v572_v15 = vmul.f32 %v2101_v5, %v2101_v5  ;;  %v573_v18 = vmul.f32 %v2106_v11, %v2106_v11 }
 0x20d   : > { %v574_v63 = vsel %vm359_vm3, %v566_v58, 0.0  ;;  %v575_v3 = vsel %vm359_vm3, %v567_v59, 0.0  ;;  %v577_v8 = vsel %vm359_vm3, %v568_v60, 0.0  ;;  %v579_v13 = vsel %vm359_vm3, %v569_v62, 0.0 }
 0x20e   : > { %v576_v4 = vadd.f32 %v575_v3, %v574_v63  ;;  %v581_v16 = vsel %vm359_vm3, %v570_v7, 0.0  ;;  %v583_v19 = vsel %vm359_vm3, %v571_v12, 0.0  ;;  %v585_v21 = vsel %vm359_vm3, %v572_v15, 0.0 }
 0x20f   : > { %v587_v24 = vsel %vm359_vm3, %v573_v18, 0.0  ;;  %v797_v18 = vld [vmem:[%s2398_s5] sm:$0x3] }
 0x210   : > { %v578_v10 = vadd.f32 %v577_v8, %v576_v4 }
 0x212   : > { %v580_v14 = vadd.f32 %v579_v13, %v578_v10 }
 0x214   : > { %v582_v17 = vadd.f32 %v581_v16, %v580_v14 }
 0x216   : > { %v584_v20 = vadd.f32 %v583_v19, %v582_v17  ;;  %v805_v19 = vsub.s32 1, %v2067_v48 }
 0x218   : > { %v586_v23 = vadd.f32 %v585_v21, %v584_v20 }
 0x21a   : > { %v588_v25 = vadd.f32 %v587_v24, %v586_v23 }
 0x21c   : > { %v589_v26 = vrot.slane %v588_v25, 4 }
 0x21e   : > { %v590_v27 = vadd.f32 %v589_v26, %v588_v25 }
 0x220   : > { %v591_v28 = vrot.slane %v590_v27, 2 }
 0x222   : > { %v592_v29 = vadd.f32 %v591_v28, %v590_v27 }
 0x224   : > { %v593_v31 = vrot.slane %v592_v29, 1 }
 0x226   : > { %v594_v32 = vadd.f32 %v593_v31, %v592_v29 }
 0x228   : > { %1468 = vmatmul.mubr.msk.f32.vlgmr.msra.gmra.mrb[2].mxu0 %vm359_vm3, %v594_v32 }
 0x229   : > { %1532 = vmatpush3.bf16.xpose.msk.msra.mxu0 %vm1962_vm2, %v1975_v6  ;;  %1486 = vmatprep.mubr.msk.f32.mxu0 %vm1785_vm0, %v1786_v1 }
 0x22a   : > { %1533 = vmatprep.subr.bf16.mxu0 %v1784_v0 }
 0x231   : > { %1536 = vmatpush3.bf16.xpose.msk.msra.mxu0 %vm1962_vm2, %v1984_v9  ;;  %v1611_v9 = vld [vmem:[%s2397_s4 + $0x4] ss:$8 sps:$4 sm:$0xff]  }
 0x232   : > { %1537 = vmatprep.subr.bf16.mxu0 %v1784_v0  ;;  %861 = vmatprep.subr.bf16.mxu1 %v1611_v9 }
 0x233   : > { %862 = vmatpush1.bf16.msra.mxu1 %v1609_v34 }
 0x239   : > { %1540 = vmatpush3.bf16.xpose.msk.msra.mxu0 %vm1962_vm2, %v2021_v22  ;;  %v1617_v22 = vld [vmem:[%s2397_s4 + $0x24] ss:$8 sps:$4 sm:$0xff]  }
 0x23a   : > { %1541 = vmatprep.subr.bf16.mxu0 %v1784_v0  ;;  %v1614_v0 = vld [vmem:[%s2397_s4 + $0x14] ss:$8 sps:$4 sm:$0xff]  }
 0x23b   : > { %863 = vmatprep.subr.bf16.mxu1 %v1614_v0 }
 0x23c   : > { %864 = vmatpush1.bf16.msra.mxu1 %v1612_v2 }
 0x23d   : > { %865 = vmatprep.subr.bf16.mxu1 %v1617_v22 }
 0x241   : > { %1544 = vmatpush3.bf16.xpose.msk.msra.mxu0 %vm1962_vm2, %v2036_v30  ;;  %v1615_v30 = vld [vmem:[%s2397_s4 + $0x20] ss:$8 sps:$4 sm:$0xff]  }
 0x242   : > { %866 = vmatpush1.bf16.msra.mxu1 %v1615_v30 }
 0x243   : > { %867 = vmatprep.subr.bf16.mxu1 %v1620_v35 }
 0x246   : > { %868 = vmatpush1.bf16.msra.mxu1 %v1618_v37 }
 0x2fb   : > { %v664_v6 = vpop.f32.mrb[2].mxu0 }
 0x2fc   : > { %v668_v1 = vmul.f32 0.0078125, %v664_v6  ;;  %v1469_v33 = vpop.f32.mrb[3].mxu0 }
 0x2fe   : > { %1487 = vmatmul.mubr.msk.f32.vlgmr.msra.gmra.mrb[4].mxu0 %vm456_vm1, %v668_v1 }
 0x3d1   : > { %v738_v38 = vpop.f32.mrb[4].mxu0 }
 0x3d2   : > { %v739_v39 = vadd.f32 1e-05, %v738_v38  ;;  %v1488_v40 = vpop.f32.mrb[5].mxu0 }
 0x3d4   : > { %1621 = vrsqrt.f32 %v739_v39 }
 0x3de   : > { %v1622_v41 = vpop.eup %1621 }
 0x3df   : > { %v746_v42 = vrot.slane %v1622_v41, %v2070_v49 }
 0x3e1   : > { %v747_v44 = vmul.f32 %v746_v42, %v2074_v53  ;;  %v748_v45 = vmul.f32 %v746_v42, %v2077_v54  ;;  %v749_v51 = vmul.f32 %v746_v42, %v2080_v55  ;;  %v750_v52 = vmul.f32 %v746_v42, %v2083_v56 }
 0x3e2   : > { %v751_v3 = vmul.f32 %v746_v42, %v2086_v57  ;;  %v752_v4 = vmul.f32 %v746_v42, %v2095_v61  ;;  %v753_v12 = vmul.f32 %v746_v42, %v2101_v5  ;;  %v754_v13 = vmul.f32 %v746_v42, %v2106_v11 }
 0x3e3   : > { %v762_v47 = vmul.f32 %v1300_v43, %v747_v44  ;;  %v763_v50 = vmul.f32 %v1300_v43, %v748_v45  ;;  %v764_v62 = vmul.f32 %v1300_v43, %v749_v51  ;;  %v765_v63 = vmul.f32 %v1300_v43, %v750_v52 }
 0x3e4   : > { %v766_v8 = vmul.f32 %v1300_v43, %v751_v3  ;;  %v767_v10 = vmul.f32 %v1300_v43, %v752_v4  ;;  %v768_v15 = vmul.f32 %v1300_v43, %v753_v12  ;;  %v769_v16 = vmul.f32 %v1300_v43, %v754_v13 }
 0x3e5   : > { %v777_v58 = vadd.f32 %v1301_v46, %v762_v47  ;;  %v778_v59 = vadd.f32 %v1301_v46, %v763_v50  ;;  %v779_v53 = vadd.f32 %v1301_v46, %v764_v62  ;;  %v780_v54 = vadd.f32 %v1301_v46, %v765_v63 }
 0x3e6   : > { %v781_v55 = vadd.f32 %v1301_v46, %v766_v8  ;;  %v782_v56 = vadd.f32 %v1301_v46, %v767_v10  ;;  %v783_v57 = vadd.f32 %v1301_v46, %v768_v15  ;;  %v784_v61 = vadd.f32 %v1301_v46, %v769_v16 }
 0x3e7   : > { %v785_v60 = vpack.c.bf16 %v778_v59, %v777_v58  ;;  %v786_v7 = vpack.c.bf16 %v780_v54, %v779_v53  ;;  %v2186_v5 = vrot.slane %v797_v18, %v2070_v49  ;;  %v2188_v11 = vrot.slane %v797_v18, %v805_v19 }
 0x3e8   : > { %v787_v14 = vpack.c.bf16 %v782_v56, %v781_v55  ;;  %v788_v17 = vpack.c.bf16 %v784_v61, %v783_v57 }
 0x3e9   : > { %1310 = vmatmul.mubr.msk.bf16.vlgmr.msra.gmra.mrb[4].mxu1 %vm359_vm3, %v785_v60 }
 0x3ea   : > { %903 = vmatprep.mubr.bf16.mxu1 %v1787_v36 }
 0x3f1   : > { %1311 = vmatmul.mubr.msk.bf16.gmra.mrb[8].mxu1 %vm359_vm3, %v786_v7 }
 0x3f2   : > { %913 = vmatprep.mubr.bf16.mxu1 %v1787_v36 }
 0x3f9   : > { %1312 = vmatmul.mubr.msk.bf16.gmra.mrb[12].mxu1 %vm359_vm3, %v787_v14 }
 0x3fa   : > { %923 = vmatprep.mubr.bf16.mxu1 %v1787_v36 }
 0x401   : > { %1313 = vmatmul.mubr.msk.bf16.gmra.mrb[16].mxu1 %vm359_vm3, %v788_v17 }
 0x4bc   : > { %v895_v20 = vpop.f32.mrb[4].mxu1 }
 0x4bd   : > { %v896_v21 = vadd.f32 %v895_v20, %v2186_v5  ;;  %v897_v23 = vpop.f32.mrb[5].mxu1 }
 0x4be   : > { %v898_v24 = vadd.f32 %v897_v23, %v2188_v11  ;;  %v899_v25 = vpop.f32.mrb[6].mxu1 }
 0x4bf   : > { %v934_v26 = vmul.f32 0.125, %v896_v21  ;;  %v900_v48 = vadd.f32 %v899_v25, %v2186_v5  ;;  %v901_v27 = vpop.f32.mrb[7].mxu1  ;;  %v1358_v49 = vpack.c.bf16 %v896_v21, %v896_v21 }
 0x4c0   : > { %v1366_v28 = vpack.c.bf16 %v898_v24, %v898_v24  ;;  %v902_v29 = vadd.f32 %v901_v27, %v2188_v11 }
 0x4c1   : > { %v1350_v31 = vpack.c.bf16 %v934_v26, %v934_v26  ;;  %v935_v32 = vmul.f32 0.125, %v900_v48  ;;  %1007 = vrot.lane.b32.xlu0 %v1358_v49, %s2404_s22  ;;  %v1359_v33 = vpack.c.bf16 %v900_v48, %v900_v48 }
 0x4c2   : > { %1071 = vst.msk [vmem:[%s2199_s21] sm:$0xf] %vm974_vm4, %v1366_v28  ;;  %v1367_v6 = vpack.c.bf16 %v902_v29, %v902_v29 }
 0x4c3   : > { %975 = vst.msk [vmem:[%s2204_s19] sm:$0xf] %vm974_vm4, %v1350_v31  ;;  %v1351_v1 = vpack.c.bf16 %v935_v32, %v935_v32 }
 0x4c4   : > { %1072 = vst.msk [vmem:[%s2199_s21 + $0x4] sm:$0xf] %vm974_vm4, %v1367_v6  ;;  %v905_v9 = vpop.f32.mrb[8].mxu1 }
 0x4c5   : > { %976 = vst.msk [vmem:[%s2204_s19 + $0x4] sm:$0xf] %vm974_vm4, %v1351_v1  ;;  %v906_v34 = vadd.f32 %v905_v9, %v2186_v5  ;;  %v907_v0 = vpop.f32.mrb[9].mxu1  ;;  %1009 = vrot.lane.b32.xlu0 %v1359_v33, %s2404_s22 }
 0x4c6   : > { %v908_v2 = vadd.f32 %v907_v0, %v2188_v11  ;;  %v909_v22 = vpop.f32.mrb[10].mxu1 }
 0x4c7   : > { %v936_v30 = vmul.f32 0.125, %v906_v34  ;;  %v910_v35 = vadd.f32 %v909_v22, %v2186_v5  ;;  %v911_v36 = vpop.f32.mrb[11].mxu1  ;;  %v1360_v37 = vpack.c.bf16 %v906_v34, %v906_v34 }
 0x4c8   : > { %v1368_v38 = vpack.c.bf16 %v908_v2, %v908_v2  ;;  %v912_v39 = vadd.f32 %v911_v36, %v2188_v11 }
 0x4c9   : > { %v1352_v40 = vpack.c.bf16 %v936_v30, %v936_v30  ;;  %v937_v41 = vmul.f32 0.125, %v910_v35  ;;  %1011 = vrot.lane.b32.xlu1 %v1360_v37, %s2404_s22  ;;  %v1361_v44 = vpack.c.bf16 %v910_v35, %v910_v35 }
 0x4ca   : > { %1073 = vst.msk [vmem:[%s2199_s21 + $0x8] sm:$0xf] %vm974_vm4, %v1368_v38  ;;  %v1369_v42 = vpack.c.bf16 %v912_v39, %v912_v39 }
 0x4cb   : > { %977 = vst.msk [vmem:[%s2204_s19 + $0x8] sm:$0xf] %vm974_vm4, %v1352_v40  ;;  %v1353_v43 = vpack.c.bf16 %v937_v41, %v937_v41 }
 0x4cc   : > { %1074 = vst.msk [vmem:[%s2199_s21 + $0xc] sm:$0xf] %vm974_vm4, %v1369_v42  ;;  %v915_v45 = vpop.f32.mrb[12].mxu1 }
 0x4cd   : > { %978 = vst.msk [vmem:[%s2204_s19 + $0xc] sm:$0xf] %vm974_vm4, %v1353_v43  ;;  %v916_v46 = vadd.f32 %v915_v45, %v2186_v5  ;;  %v917_v47 = vpop.f32.mrb[13].mxu1  ;;  %1013 = vrot.lane.b32.xlu1 %v1361_v44, %s2404_s22 }
 0x4ce   : > { %v918_v50 = vadd.f32 %v917_v47, %v2188_v11  ;;  %v919_v51 = vpop.f32.mrb[14].mxu1 }
 0x4cf   : > { %v938_v52 = vmul.f32 0.125, %v916_v46  ;;  %v1362_v58 = vpack.c.bf16 %v916_v46, %v916_v46  ;;  %v920_v59 = vadd.f32 %v919_v51, %v2186_v5  ;;  %v921_v60 = vpop.f32.mrb[15].mxu1 }
 0x4d0   : > { %v1370_v62 = vpack.c.bf16 %v918_v50, %v918_v50  ;;  %v922_v63 = vadd.f32 %v921_v60, %v2188_v11 }
 0x4d1   : > { %v1354_v53 = vpack.c.bf16 %v938_v52, %v938_v52  ;;  %v939_v54 = vmul.f32 0.125, %v920_v59  ;;  %v1363_v3 = vpack.c.bf16 %v920_v59, %v920_v59  ;;  %1015 = vrot.lane.b32.xlu0 %v1362_v58, %s2404_s22 }
 0x4d2   : > { %1075 = vst.msk [vmem:[%s2199_s21 + $0x10] sm:$0xf] %vm974_vm4, %v1370_v62  ;;  %v1371_v4 = vpack.c.bf16 %v922_v63, %v922_v63 }
 0x4d3   : > { %979 = vst.msk [vmem:[%s2204_s19 + $0x10] sm:$0xf] %vm974_vm4, %v1354_v53  ;;  %v1355_v7 = vpack.c.bf16 %v939_v54, %v939_v54  ;;  %1017 = vrot.lane.b32.xlu1 %v1363_v3, %s2404_s22 }
 0x4d4   : > { %1076 = vst.msk [vmem:[%s2199_s21 + $0x14] sm:$0xf] %vm974_vm4, %v1371_v4  ;;  %v925_v8 = vpop.f32.mrb[16].mxu1 }
 0x4d5   : > { %980 = vst.msk [vmem:[%s2204_s19 + $0x14] sm:$0xf] %vm974_vm4, %v1355_v7  ;;  %v926_v10 = vadd.f32 %v925_v8, %v2186_v5  ;;  %v927_v55 = vpop.f32.mrb[17].mxu1 }
 0x4d6   : > { %v928_v56 = vadd.f32 %v927_v55, %v2188_v11  ;;  %v929_v12 = vpop.f32.mrb[18].mxu1 }
 0x4d7   : > { %v940_v13 = vmul.f32 0.125, %v926_v10  ;;  %v1364_v14 = vpack.c.bf16 %v926_v10, %v926_v10  ;;  %v930_v15 = vadd.f32 %v929_v12, %v2186_v5  ;;  %v931_v16 = vpop.f32.mrb[19].mxu1 }
 0x4d8   : > { %v1372_v57 = vpack.c.bf16 %v928_v56, %v928_v56  ;;  %v932_v61 = vadd.f32 %v931_v16, %v2188_v11 }
 0x4d9   : > { %v1356_v17 = vpack.c.bf16 %v940_v13, %v940_v13  ;;  %v941_v18 = vmul.f32 0.125, %v930_v15  ;;  %v1365_v19 = vpack.c.bf16 %v930_v15, %v930_v15  ;;  %1019 = vrot.lane.b32.xlu0 %v1364_v14, %s2404_s22 }
 0x4da   : > { %1077 = vst.msk [vmem:[%s2199_s21 + $0x18] sm:$0xf] %vm974_vm4, %v1372_v57  ;;  %v1373_v5 = vpack.c.bf16 %v932_v61, %v932_v61 }
 0x4db   : > { %981 = vst.msk [vmem:[%s2204_s19 + $0x18] sm:$0xf] %vm974_vm4, %v1356_v17  ;;  %v1357_v20 = vpack.c.bf16 %v941_v18, %v941_v18  ;;  %1021 = vrot.lane.b32.xlu1 %v1365_v19, %s2404_s22  ;;  %s1657_s22 = sshll.u32 %s1789_s10, 4  ;;  %s1658_s22 = int_to_ptr.vmem [resolvable:$false] %s1657_s22 }
 0x4dc   : > { %1078 = vst.msk [vmem:[%s2199_s21 + $0x1c] sm:$0xf] %vm974_vm4, %v1373_v5  ;;  %s1659_s24 = scalar_lea.vmem %s1658_s22, 1024  ;;  %p1660_p8 = scmp.lt.s32.totalorder %s2261_s16, %s1658_s22 }
 0x4dd   : > { %982 = vst.msk [vmem:[%s2204_s19 + $0x1c] sm:$0xf] %vm974_vm4, %v1357_v20  ;;  %p1661_p10 = scmp.lt.s32.totalorder %s1659_s24, %s1653_s23 }
 0x4df   : > { %p1662_p0 = por %p1661_p10, %p1660_p8 }
 0x4e1   : > { %p1663_p2 = pnand %p1662_p0, %p1656_p13 }
 0x4e3   : > { %1666 = shalt.err (!%p1663_p2)
}
 0x4e4   : > { %s1667_s19 = scalar_lea.hbm %s2259_s12, 512  ;;  %s1671_s10 = scalar_lea.hbm %s2399_s6, 1024 }
 0x4e5   : > { %p1668_p4 = scmp.ne.s32.totalorder %s2259_s12, %s1667_s19  ;;  %p1672_p9 = scmp.lt.u32.totalorder %s2259_s12, %s2399_s6 }
 0x4e6   : > { %p1673_p1 = scmp.lt.u32.totalorder %s1671_s10, %s1667_s19  ;;  %p1675_p6 = scmp.lt.u32.totalorder %s1667_s19, %s2259_s12 }
 0x4e7   : > { %p1669_p5 = pnand %p1668_p4, %p2417_p11 }
 0x4e8   : > { %p1674_p3 = por %p1673_p1, %p1672_p9 }
 0x4e9   : > { %p1670_p7 = pneg %p1669_p5 }
 0x4ea   : > { %p1676_p12 = por %p1675_p6, %p1674_p3 }
 0x4ec   : > { %p1677_p13 = pnand %p1676_p12, %p1670_p7 }
 0x4ee   : > { %1680 = shalt.err (!%p1677_p13)
}
 0x4ef   : > { %s1790_s23 = smov 4   ;;  %s2418_s24 = smov 64  }
 0x4f0   : > { %s2419_s1 = scalar_lea.sflag [#allocation4], %s1944_s25  ;;  %s334_s0 = scalar_lea.vmem [#allocation6], %s2191_s15 }
 0x4f1   : > { %1547 = dma.vmem_to_hbm [thread:$0]  (%p2417_p11), %s2261_s16, 512, %s2259_s12, %s2419_s1, %s2418_s24, %s2418_s24, %s1790_s23  }
 0x4f2   : > { %s1119_s1 = sshll.u32 %s334_s0, 4  ;;  %s1084_s25 = sand.u32 1, %s1859_s9   ;;  %s2303_s1 = int_to_ptr.vmem [resolvable:$true] %s1119_s1 }
 0x4f3   : > { %s1135_s15 = sshll.u32 %s2199_s21, 4  ;;  %s2310_s13 = scalar_lea.hbm %s2400_s7, %s2246_s20  ;;  %s2312_s15 = int_to_ptr.vmem [resolvable:$true] %s1135_s15 }
 0x4f4   : > { %s2318_s9 = scalar_lea.hbm %s2401_s8, %s2246_s20  ;;  %s2321_s21 = scalar_lea.sflag [#allocation7], %s1084_s25 }
 0x4f5   : > { %s1681_s10 = scalar_lea.vmem %s2303_s1, 512  ;;  %s1791_s22 = smov [#allocation6]  }
 0x4f6   : > { %p1682_p8 = scmp.ne.s32.totalorder %s2303_s1, %s1681_s10  ;;  %s1685_s16 = sshll.u32 %s1791_s22, 4  ;;  %s1686_s16 = int_to_ptr.vmem [resolvable:$false] %s1685_s16 }
 0x4f7   : > { %s1687_s12 = scalar_lea.vmem %s1686_s16, 1024  ;;  %p1688_p2 = scmp.lt.s32.totalorder %s2303_s1, %s1686_s16 }
 0x4f8   : > { %p1683_p10 = pnand %p1682_p8, %p2417_p11  ;;  %p1689_p4 = scmp.lt.s32.totalorder %s1687_s12, %s1681_s10 }
 0x4fa   : > { %p1684_p0 = pneg %p1683_p10  ;;  %p1690_p5 = por %p1689_p4, %p1688_p2 }
 0x4fc   : > { %p1691_p7 = pnand %p1690_p5, %p1684_p0 }
 0x533   : > { %v1008_v11 = vpop.permute.xlu0 %1007 }
 0x534   : > { %1031 = vst.msk [vmem:[%s334_s0] sm:$0xf] %vm974_vm4, %v1008_v11 }
 0x537   : > { %v1010_v21 = vpop.permute.xlu0 %1009 }
 0x538   : > { %1032 = vst.msk [vmem:[%s334_s0 + $0x4] sm:$0xf] %vm974_vm4, %v1010_v21 }
 0x53b   : > { %v1012_v23 = vpop.permute.xlu1 %1011 }
 0x53c   : > { %1033 = vst.msk [vmem:[%s334_s0 + $0x8] sm:$0xf] %vm974_vm4, %v1012_v23 }
 0x53f   : > { %v1014_v24 = vpop.permute.xlu1 %1013 }
 0x540   : > { %1034 = vst.msk [vmem:[%s334_s0 + $0xc] sm:$0xf] %vm974_vm4, %v1014_v24 }
 0x543   : > { %v1016_v25 = vpop.permute.xlu0 %1015 }
 0x544   : > { %1035 = vst.msk [vmem:[%s334_s0 + $0x10] sm:$0xf] %vm974_vm4, %v1016_v25 }
 0x545   : > { %v1018_v26 = vpop.permute.xlu1 %1017 }
 0x546   : > { %1036 = vst.msk [vmem:[%s334_s0 + $0x14] sm:$0xf] %vm974_vm4, %v1018_v26 }
 0x54b   : > { %v1020_v48 = vpop.permute.xlu0 %1019 }
 0x54c   : > { %1037 = vst.msk [vmem:[%s334_s0 + $0x18] sm:$0xf] %vm974_vm4, %v1020_v48 }
 0x54d   : > { %v1022_v27 = vpop.permute.xlu1 %1021 }
 0x54e   : > { %1038 = vst.msk [vmem:[%s334_s0 + $0x1c] sm:$0xf] %vm974_vm4, %v1022_v27 }
 0x54f   : > { %1694 = shalt.err (!%p1691_p7)
}
 0x550   : > { %s1695_s20 = scalar_lea.hbm %s2310_s13, 512  ;;  %s1699_s19 = scalar_lea.hbm %s2400_s7, 1024 }
 0x551   : > { %p1696_p9 = scmp.ne.s32.totalorder %s2310_s13, %s1695_s20  ;;  %p1700_p6 = scmp.lt.u32.totalorder %s2310_s13, %s2400_s7 }
 0x552   : > { %p1701_p12 = scmp.lt.u32.totalorder %s1699_s19, %s1695_s20  ;;  %p1703_p8 = scmp.lt.u32.totalorder %s1695_s20, %s2310_s13 }
 0x553   : > { %p1697_p1 = pnand %p1696_p9, %p2417_p11 }
 0x554   : > { %p1702_p13 = por %p1701_p12, %p1700_p6 }
 0x555   : > { %p1698_p3 = pneg %p1697_p1 }
 0x556   : > { %p1704_p10 = por %p1703_p8, %p1702_p13 }
 0x558   : > { %p1705_p0 = pnand %p1704_p10, %p1698_p3 }
 0x55a   : > { %1708 = shalt.err (!%p1705_p0)
}
 0x55b   : > { %1548 = dma.vmem_to_hbm [thread:$0]  (%p2417_p11), %s2303_s1, 512, %s2310_s13, %s2321_s21, %s2418_s24, %s2418_s24, %s1790_s23  }
 0x55c   : > { %s1709_s10 = scalar_lea.vmem %s2312_s15, 512  ;;  %s1792_s16 = smov [#allocation8]  }
 0x55d   : > { %p1710_p2 = scmp.ne.s32.totalorder %s2312_s15, %s1709_s10  ;;  %s1713_s12 = sshll.u32 %s1792_s16, 4  ;;  %s1714_s12 = int_to_ptr.vmem [resolvable:$false] %s1713_s12 }
 0x55e   : > { %s1715_s20 = scalar_lea.vmem %s1714_s12, 1024  ;;  %p1716_p7 = scmp.lt.s32.totalorder %s2312_s15, %s1714_s12 }
 0x55f   : > { %p1711_p4 = pnand %p1710_p2, %p2417_p11  ;;  %p1717_p9 = scmp.lt.s32.totalorder %s1715_s20, %s1709_s10 }
 0x561   : > { %p1712_p5 = pneg %p1711_p4  ;;  %p1718_p1 = por %p1717_p9, %p1716_p7 }
 0x563   : > { %p1719_p3 = pnand %p1718_p1, %p1712_p5 }
 0x565   : > { %1722 = shalt.err (!%p1719_p3)
}
 0x566   : > { %s1723_s1 = scalar_lea.hbm %s2318_s9, 512  ;;  %s1727_s25 = scalar_lea.hbm %s2401_s8, 1024 }
 0x567   : > { %p1724_p6 = scmp.ne.s32.totalorder %s2318_s9, %s1723_s1  ;;  %p1728_p8 = scmp.lt.u32.totalorder %s2318_s9, %s2401_s8 }
 0x568   : > { %p1729_p10 = scmp.lt.u32.totalorder %s1727_s25, %s1723_s1  ;;  %p1731_p2 = scmp.lt.u32.totalorder %s1723_s1, %s2318_s9 }
 0x569   : > { %p1725_p12 = pnand %p1724_p6, %p2417_p11 }
 0x56a   : > { %p1730_p0 = por %p1729_p10, %p1728_p8 }
 0x56b   : > { %p1726_p13 = pneg %p1725_p12 }
 0x56c   : > { %p1732_p4 = por %p1731_p2, %p1730_p0 }
 0x56e   : > { %p1733_p5 = pnand %p1732_p4, %p1726_p13 }
 0x570   : > { %1736 = shalt.err (!%p1733_p5)
}
 0x571   : > { %1549 = dma.vmem_to_hbm [thread:$0]  (%p2417_p11), %s2312_s15, 512, %s2318_s9, %s2321_s21, %s2418_s24, %s2418_s24, %s1790_s23  }
 0x572 PF: > { %s1150_s22 = sand.u32 1, %s1767_s27   ;;  %p2420_p7 = scmp.ne.s32.totalorder %s2411_s18, 0 }
 0x573   : > { %p2421_p9 = scmp.ge.s32.totalorder %s1779_s30, 2  ;;  %s1151_s10 = scalar_lea.sflag [#allocation4], %s1150_s22 }
 0x575   : > { %p1558_p1 = pnand %p2421_p9, %p2420_p7 }
 0x577   : > { %1758 = dma.done.wait (!%p1558_p1), %s1151_s10, 512  }
 0x578   : > { %1760 = vsyncadd (!%p1558_p1), %s1151_s10, 4294966784  ;;  %s2422_s17 = sadd.s32 4294967294, %s1779_s30  }
 0x579   : > { %s1159_s16 = sand.u32 1, %s2422_s17  }
 0x57a   : > { %s1160_s12 = scalar_lea.sflag [#allocation7], %s1159_s16 }
 0x57b   : > { %1762 = dma.done.wait (!%p1558_p1), %s1160_s12, 1024  }
 0x57c   : > { %1764 = vsyncadd (!%p1558_p1), %s1160_s12, 4294966272  ;;  %p25_p11 = scmp.ge.s32.totalorder %s1863_s11, 4   ;;  %s2423_s27 = smov %s1771_s28 }
 0x57d   : > { %s2424_s28 = smov %s1775_s29  ;;  %s2425_s29 = smov %s1875_s14 }
 0x57e   : > { %s2426_s30 = smov %s1863_s11  ;;  %27 = sbr.rel (!%p25_p11) target bundleno = 10 (0xa), region = 121 }
 0x585   :  { %1174 = vsyncpa [#allocation3], 1 }
 0x586   :  { %1176 = vsyncpa [#allocation3 + $0x1], 1 }
 0x587   :  { %1177 = vsyncpa [#allocation4], 1 }
 0x588   :  { %1179 = vsyncpa [#allocation4 + $0x1], 1 }
 0x589   :  { %1180 = vsyncpa [#allocation7], 1 }
 0x58a   :  { %1182 = vsyncpa [#allocation7 + $0x1], 1 }

</bundles_post_ra>
